<compile_context>
chip_gen: v7x
topology: tpu7x:2x2x1
jax: 0.10.0
libtpu: 0.0.40
codegen_flags: <defaults>
</compile_context>

<pallas_src>
import functools

import jax
import jax.numpy as jnp
from jax.experimental import pallas as pl
from jax.experimental.pallas import tpu as pltpu

_LANE = 128


def _sublane_pack(dtype) -> int:
    # rows per packed sublane group: 8 for 4-byte, 16 for 2-byte, 32 for 1-byte.
    return max(8, 32 // jnp.dtype(dtype).itemsize)


def _vmem_budgets():
    """Return (tile_budget_bytes, vmem_limit_bytes) sized per TPU generation."""
    cap = None
    try:
        info = pltpu.get_tpu_info()
        cap = getattr(info, "vmem_capacity_bytes", None)
    except Exception:
        cap = None
    if cap is None:
        cap = 64 * 1024 * 1024  # conservative default: v7x per-TensorCore VMEM
    if cap >= 96 * 1024 * 1024:
        # v5e / v6e: 128 MiB physical VMEM -> bigger tiles, fewer grid steps.
        return 48 * 1024 * 1024, 96 * 1024 * 1024
    # v7x: 64 MiB per TensorCore -> leave headroom for fp32 temporaries.
    return 16 * 1024 * 1024, 40 * 1024 * 1024


def _pick_block_rows(rows: int, hidden: int, in_dtype, out_dtype, tile_budget: int) -> int:
    in_b = jnp.dtype(in_dtype).itemsize
    out_b = jnp.dtype(out_dtype).itemsize
    pack = max(_sublane_pack(in_dtype), _sublane_pack(out_dtype))
    # Double-buffered input + output tiles, plus ~8 B/elem for the in-kernel
    # fp32 intermediates (normalize result / weight product) so the scoped
    # VMEM limit is never exceeded on 64 MiB parts.
    bytes_per_row = hidden * (2 * (in_b + out_b) + 8)
    block_rows = max(pack, (tile_budget // bytes_per_row) // pack * pack)
    rows_rounded = pl.cdiv(rows, pack) * pack
    block_rows = min(block_rows, rows_rounded)
    # Prefer an even number of grid steps when the grid is short and odd
    # (2-TensorCore balance on v7x); never grow beyond the budgeted size.
    g = pl.cdiv(rows, block_rows)
    if 1 < g < 16 and g % 2 == 1:
        block_rows = min(block_rows, pl.cdiv(pl.cdiv(rows, g + 1), pack) * pack)
    return max(block_rows, pack)


def _rmsnorm_kernel(x_ref, w_ref, o_ref, *, eps, inv_hidden, input_dtype):
    # x_ref: (block_rows, hidden_p), w_ref: (1, hidden_p), o_ref: (block_rows, hidden_p)
    # Mean of squares without keeping a block-wide f32 copy live across the
    # reduction: compute the row sum first, then re-read the VMEM tile.
    sumsq = jnp.sum(jnp.square(x_ref[...].astype(jnp.float32)), axis=-1, keepdims=True)
    inv_rms = jax.lax.rsqrt(sumsq * inv_hidden + eps)
    # Match torch: normalized activations are cast back to the *input* dtype
    # BEFORE the fp32 weight multiply (this rounding matters for bf16/fp16).
    normed = (x_ref[...].astype(jnp.float32) * inv_rms).astype(input_dtype)
    y = w_ref[...].astype(jnp.float32) * normed.astype(jnp.float32)
    o_ref[...] = y.astype(o_ref.dtype)


def rmsnorm(x, weight, eps=1e-6, block_rows=None, out_dtype=None):
    """x: (..., hidden), weight: (hidden,).

    Default output dtype follows torch promotion (fp32 weight * input-dtype
    activations).  Pass out_dtype (e.g. jnp.bfloat16) to skip the promotion
    and cut HBM store traffic when the consumer accepts it.
    """
    orig_shape = x.shape
    hidden = orig_shape[-1]
    rows = 1
    for d in orig_shape[:-1]:
        rows *= d

    if out_dtype is None:
        # torch: fp32 weight * activations cast back to input dtype -> promotion.
        out_dtype = jnp.result_type(weight.dtype, x.dtype)

    # Keep the lane dim dense: pad hidden (and weight) to a multiple of 128 so
    # the output is written with unmasked, lane-dense stores.  Padded columns
    # are zeros -> they do not perturb the sum of squares, and the mean uses
    # the ORIGINAL hidden size, so results are exact.
    hidden_p = pl.cdiv(hidden, _LANE) * _LANE
    x2d = x.reshape(rows, hidden)
    w2d = weight.reshape(1, hidden)
    if hidden_p != hidden:
        pad = hidden_p - hidden
        x2d = jnp.pad(x2d, ((0, 0), (0, pad)))
        w2d = jnp.pad(w2d, ((0, 0), (0, pad)))

    tile_budget, vmem_limit = _vmem_budgets()
    if block_rows is None:
        block_rows = _pick_block_rows(rows, hidden_p, x.dtype, out_dtype, tile_budget)
    grid = (pl.cdiv(rows, block_rows),)

    in_b = jnp.dtype(x.dtype).itemsize
    out_b = jnp.dtype(out_dtype).itemsize
    cost = pl.CostEstimate(
        flops=6 * rows * hidden,
        transcendentals=rows,
        bytes_accessed=rows * hidden_p * (in_b + out_b)
        + hidden_p * jnp.dtype(weight.dtype).itemsize,
    )

    out = pl.pallas_call(
        functools.partial(
            _rmsnorm_kernel,
            eps=eps,
            inv_hidden=1.0 / float(hidden),
            input_dtype=x.dtype,
        ),
        out_shape=jax.ShapeDtypeStruct((rows, hidden_p), out_dtype),
        grid_spec=pltpu.PrefetchScalarGridSpec(
            num_scalar_prefetch=0,
            grid=grid,
            in_specs=[
                pl.BlockSpec((block_rows, hidden_p), lambda i: (i, 0)),
                # Weight block index never changes -> stays resident in VMEM
                # for the whole grid (one DMA total).
                pl.BlockSpec((1, hidden_p), lambda i: (0, 0)),
            ],
            out_specs=pl.BlockSpec((block_rows, hidden_p), lambda i: (i, 0)),
        ),
        compiler_params=pltpu.CompilerParams(
            dimension_semantics=("parallel",),  # lets v7x shard rows over 2 TCs
            vmem_limit_bytes=vmem_limit,
        ),
        cost_estimate=cost,
    )(x2d, w2d)

    if hidden_p != hidden:
        out = out[:, :hidden]
    return out.reshape(orig_shape[:-1] + (hidden,))


def rmsnorm_ref(x, weight, eps=1e-6):
    x32 = x.astype(jnp.float32)
    var = jnp.mean(x32 * x32, axis=-1, keepdims=True)
    normed = (x32 * jax.lax.rsqrt(var + eps)).astype(x.dtype)
    return weight.astype(jnp.float32) * normed.astype(jnp.float32)


if __name__ == "__main__":
    key = jax.random.PRNGKey(0)
    batch, seq, hidden = 2, 8, 128
    x = jax.random.normal(key, (batch, seq, hidden), dtype=jnp.float32)

    # Deterministic parameter init: weight = ones(hidden), as in __init__.
    weight = jnp.ones((hidden,), dtype=jnp.float32)

    # f32 path
    y = jax.block_until_ready(rmsnorm(x, weight, eps=1e-6))
    y_ref = rmsnorm_ref(x, weight, eps=1e-6)
    assert y.shape == x.shape and y.dtype == jnp.float32
    assert jnp.allclose(y, y_ref, atol=1e-5, rtol=1e-5), "f32 mismatch vs reference"

    # bf16 activations: exercises the input-dtype rounding before the fp32
    # weight multiply (torch semantics) and the promoted f32 output.
    xb = x.astype(jnp.bfloat16)
    yb = jax.block_until_ready(rmsnorm(xb, weight, eps=1e-6))
    yb_ref = rmsnorm_ref(xb, weight, eps=1e-6)
    assert yb.dtype == jnp.float32
    assert jnp.allclose(yb, yb_ref, atol=1e-2, rtol=1e-2), "bf16 mismatch vs reference"

    # Opt-in bf16 output (skips torch promotion, ~1.5x less HBM traffic).
    yb16 = jax.block_until_ready(rmsnorm(xb, weight, eps=1e-6, out_dtype=jnp.bfloat16))
    assert yb16.dtype == jnp.bfloat16
    assert jnp.allclose(
        yb16.astype(jnp.float32), yb_ref, atol=3e-2, rtol=3e-2
    ), "bf16-out mismatch vs reference"

    # Non-lane-aligned hidden and odd rows: exercises the pad-to-128 path and
    # the cdiv grid with a masked tail block.
    x_odd = jax.random.normal(key, (3, 5, 96), dtype=jnp.float32)
    w_odd = jnp.ones((96,), dtype=jnp.float32)
    y_odd = jax.block_until_ready(rmsnorm(x_odd, w_odd, eps=1e-6))
    assert jnp.allclose(
        y_odd, rmsnorm_ref(x_odd, w_odd), atol=1e-5, rtol=1e-5
    ), "padded-hidden mismatch vs reference"

    print("KERNEL_OK")
</pallas_src>

<mosaic_0001>
module attributes {stable_mosaic.version = 11 : i64} {
  func.func @_rmsnorm_kernel(%arg0: i32, %arg1: memref<16x128xf32, #tpu.memory_space<vmem>>, %arg2: memref<1x128xf32, #tpu.memory_space<vmem>>, %arg3: memref<16x128xf32, #tpu.memory_space<vmem>>) attributes {dimension_semantics = [#tpu.dimension_semantics<parallel>], iteration_bounds = array<i64: 1>, scalar_prefetch = 0 : i64, scratch_operands = 0 : i64, tpu.core_type = #tpu.core_type<tc>, window_params = [{transform_indices = @transform_0, window_bounds = array<i64: 16, 128>}, {pipeline_mode = #tpu.pipeline_mode<synchronous>, transform_indices = @transform_1, window_bounds = array<i64: 1, 128>}, {transform_indices = @transform_2, window_bounds = array<i64: 16, 128>}]} {
    %c0 = arith.constant 0 : index
    %c0_0 = arith.constant 0 : index
    %0 = vector.load %arg1[%c0, %c0_0] : memref<16x128xf32, #tpu.memory_space<vmem>>, vector<16x128xf32>
    %1 = arith.mulf %0, %0 : vector<16x128xf32>
    %cst = arith.constant dense<0.000000e+00> : vector<16xf32>
    %2 = vector.multi_reduction <add>, %1, %cst [1] : vector<16x128xf32> to vector<16xf32>
    %3 = vector.shape_cast %2 : vector<16xf32> to vector<16x1xf32>
    %cst_1 = arith.constant 7.812500e-03 : f32
    %4 = vector.broadcast %cst_1 : f32 to vector<16x1xf32>
    %5 = arith.mulf %3, %4 : vector<16x1xf32>
    %cst_2 = arith.constant 9.99999997E-7 : f32
    %6 = vector.broadcast %cst_2 : f32 to vector<16x1xf32>
    %7 = arith.addf %5, %6 : vector<16x1xf32>
    %8 = math.rsqrt %7 : vector<16x1xf32>
    %c0_3 = arith.constant 0 : index
    %c0_4 = arith.constant 0 : index
    %9 = vector.load %arg1[%c0_3, %c0_4] : memref<16x128xf32, #tpu.memory_space<vmem>>, vector<16x128xf32>
    %10 = vector.broadcast %8 : vector<16x1xf32> to vector<16x128xf32>
    %11 = arith.mulf %9, %10 : vector<16x128xf32>
    %c0_5 = arith.constant 0 : index
    %c0_6 = arith.constant 0 : index
    %12 = vector.load %arg2[%c0_5, %c0_6] : memref<1x128xf32, #tpu.memory_space<vmem>>, vector<1x128xf32>
    %13 = vector.broadcast %12 : vector<1x128xf32> to vector<16x128xf32>
    %14 = arith.mulf %13, %11 : vector<16x128xf32>
    %c0_7 = arith.constant 0 : index
    %c0_8 = arith.constant 0 : index
    %15 = vector.load %arg3[%c0_7, %c0_8] : memref<16x128xf32, #tpu.memory_space<vmem>>, vector<16x128xf32>
    tpu.vector_store %arg3[%c0_7, %c0_8], %14 {strides = array<i32>} : memref<16x128xf32, #tpu.memory_space<vmem>>, vector<16x128xf32>,
    return
  }
  func.func @transform_0(%arg0: i32) -> (i32, i32) {
    %c0_i32 = arith.constant 0 : i32
    %c0_i32_0 = arith.constant 0 : i32
    return %arg0, %c0_i32 : i32, i32
  }
  func.func @transform_1(%arg0: i32) -> (i32, i32) {
    %c0_i32 = arith.constant 0 : i32
    %c0_i32_0 = arith.constant 0 : i32
    %c0_i32_1 = arith.constant 0 : i32
    return %c0_i32, %c0_i32_0 : i32, i32
  }
  func.func @transform_2(%arg0: i32) -> (i32, i32) {
    %c0_i32 = arith.constant 0 : i32
    %c0_i32_0 = arith.constant 0 : i32
    return %arg0, %c0_i32 : i32, i32
  }
}

</mosaic_0001>

<bundles_post_ra>
// kernel: tpu_custom_call.1
= control target key start
LH: loop header
LB: loop body
LE: loop exit
PB: predicated region body
PF: predicated region fallthrough
CT: control target
= control target key end

     0   :  { %7 = vsyncpa [#allocation3], 0  ;;  %s179_s0 = inlined_call_operand.hbm [shape: f32[16,128], index: 0, kind: input, shape index: {}]   ;;  %s180_s1 = inlined_call_operand.vmem [shape: f32[1,128], index: 1, kind: input, shape index: {}]   ;;  %s181_s2 = inlined_call_operand.hbm [shape: f32[16,128], index: 2, kind: output, shape index: {}]  }
   0x1   :  { %8 = vsyncpa [#allocation4], 0  ;;  %s127_s9 = smov [#allocation2]   ;;  %s79_s13 = scalar_lea.hbm %s179_s0, 256 }
   0x2   :  { %s14_s10 = sshll.u32 %s127_s9, 4  ;;  %p80_p0 = scmp.ne.s32.totalorder %s179_s0, %s79_s13  ;;  %s15_s10 = int_to_ptr.vmem [resolvable:$true] %s14_s10 }
   0x3   :  { %p83_p1 = scmp.lt.u32.totalorder %s79_s13, %s179_s0 }
   0x5   :  { %p85_p2 = pnand %p83_p1, %p80_p0 }
   0x7   :  { %88 = shalt.err (!%p85_p2)
}
   0x8   :  { %s89_s18 = scalar_lea.vmem %s15_s10, 256  ;;  %p94_p4 = scmp.lt.s32.totalorder %s15_s10, %s15_s10 }
   0x9   :  { %p90_p3 = scmp.ne.s32.totalorder %s15_s10, %s89_s18  ;;  %p95_p5 = scmp.lt.s32.totalorder %s89_s18, %s89_s18 }
   0xb   :  { %p96_p6 = por %p95_p5, %p94_p4 }
   0xd   :  { %p97_p7 = pnand %p96_p6, %p90_p3 }
   0xf   :  { %100 = shalt.err (!%p97_p7)
}
  0x10   :  { %s128_s19 = smov 128   ;;  %s129_s20 = smov 8  }
  0x11   :  { %20 = dma.hbm_to_vmem [thread:$0]  %s179_s0, 256, %s15_s10, [#allocation3], %s128_s19, %s128_s19, %s129_s20  }
  0x12   :  { %123 = dma.done.wait [#allocation3], 256  }
  0x13   :  { %124 = vsyncadd [#allocation3], 4294967040  ;;  %v26_v0 = vld [vmem:[#allocation2] sm:$0xff]  ;;  %v27_v1 = vld [vmem:[#allocation2 + $0x8] sm:$0xff]  ;;  %s130_s0 = smov [#allocation5]  }
  0x14   :  { %v28_v2 = vmul.f32 %v26_v0, %v26_v0  ;;  %v29_v3 = vmul.f32 %v27_v1, %v27_v1  ;;  %v70_v11 = vld [vmem:[%s180_s1] ss:$0 sm:$0xff]  ;;  %s58_s25 = sshll.u32 %s130_s0, 4  ;;  %s59_s25 = int_to_ptr.vmem [resolvable:$true] %s58_s25 }
  0x15   :  { %s101_s26 = scalar_lea.vmem %s59_s25, 256  ;;  %p106_p9 = scmp.lt.s32.totalorder %s59_s25, %s59_s25 }
  0x16   :  { %30 = vadd.xlane.f32.xlu0 %v28_v2  ;;  %p102_p8 = scmp.ne.s32.totalorder %s59_s25, %s101_s26  ;;  %p107_p10 = scmp.lt.s32.totalorder %s101_s26, %s101_s26 }
  0x18   :  { %p108_p11 = por %p107_p10, %p106_p9 }
  0x1a   :  { %32 = vadd.xlane.f32.xlu0 %v29_v3  ;;  %p109_p12 = pnand %p108_p11, %p102_p8 }
  0xa3   :  { %v31_v4 = vpop.xlane.xlu0 %30 }
  0xa4   :  { %v34_v5 = vmul.f32 0.0078125, %v31_v4 }
  0xa6   :  { %v36_v6 = vadd.f32 1e-06, %v34_v5 }
  0xa7   :  { %v33_v7 = vpop.xlane.xlu0 %32 }
  0xa8   :  { %75 = vrsqrt.f32 %v36_v6  ;;  %v35_v8 = vmul.f32 0.0078125, %v33_v7 }
  0xaa   :  { %v37_v9 = vadd.f32 1e-06, %v35_v8 }
  0xac   :  { %77 = vrsqrt.f32 %v37_v9 }
  0xb2   :  { %v76_v10 = vpop.eup %75 }
  0xb3   :  { %v40_v12 = vmul.f32 %v76_v10, %v26_v0 }
  0xb5   :  { %v49_v13 = vmul.f32 %v70_v11, %v40_v12 }
  0xb6   :  { %v78_v14 = vpop.eup %77 }
  0xb7   :  { %v41_v15 = vmul.f32 %v78_v14, %v27_v1  ;;  %51 = vst [vmem:[#allocation5] sm:$0xff] %v49_v13 }
  0xb9   :  { %v50_v16 = vmul.f32 %v70_v11, %v41_v15 }
  0xbb   :  { %52 = vst [vmem:[#allocation5 + $0x8] sm:$0xff] %v50_v16 }
  0xbc   :  { %112 = shalt.err (!%p109_p12)
}
  0xbd   :  { %s113_s1 = scalar_lea.hbm %s181_s2, 256 }
  0xbe   :  { %p114_p13 = scmp.ne.s32.totalorder %s181_s2, %s113_s1  ;;  %p117_p0 = scmp.lt.u32.totalorder %s113_s1, %s181_s2 }
  0xc0   :  { %p119_p1 = pnand %p117_p0, %p114_p13 }
  0xc2   :  { %122 = shalt.err (!%p119_p1)
}
  0xc3   :  { %64 = dma.vmem_to_hbm [thread:$0]  %s59_s25, 256, %s181_s2, [#allocation4], %s128_s19, %s128_s19, %s129_s20  }
  0xc4   :  { %125 = dma.done.wait [#allocation4], 256  }
  0xc5   :  { %126 = vsyncadd [#allocation4], 4294967040 }
  0xc6   :  { %68 = vsyncpa [#allocation3], 1 }
  0xc7   :  { %69 = vsyncpa [#allocation4], 1 }

</bundles_post_ra>
